<compile_context>
chip_gen: v7x
topology: tpu7x:2x2x1
jax: 0.10.0
libtpu: 0.0.40
codegen_flags: <defaults>
</compile_context>

<pallas_src>
import jax
import jax.numpy as jnp
from jax.experimental import pallas as pl
from jax.experimental.pallas import tpu as pltpu


def attention_kernel(hidden_ref, enc_ref, wh_ref, we_ref, b_ref, v_ref, out_ref):
    # hidden_ref : (TB, H)       enc_ref : (TB*S, 2H)   (already 2D, from wrapper)
    # wh_ref     : (H, H)        we_ref  : (2H, H)
    # b_ref      : (1, H)        v_ref   : (1, H)
    # out_ref    : (TB, S)
    tb, s = out_ref.shape
    h = wh_ref.shape[1]

    # Encoder projection as ONE large-M MXU matmul: (TB*S, 2H) @ (2H, H),
    # bf16 operands, f32 accumulation.
    eproj = jnp.dot(enc_ref[...], we_ref[...],
                    preferred_element_type=jnp.float32)              # (TB*S, H)

    # Hidden projection once per batch tile, with the bias folded in here
    # (a (TB,H) add instead of a (TB,S,H) broadcast-add).
    hb = (jnp.dot(hidden_ref[...], wh_ref[...],
                  preferred_element_type=jnp.float32)
          + b_ref[...].astype(jnp.float32))                          # (TB, H)

    v = v_ref[...].astype(jnp.float32)                               # (1, H)

    # energy = tanh(W_e enc + W_h hidden + b); post-matmul math stays in f32
    # (v5e has no bf16 VPU/EUP path).
    energy = jnp.tanh(eproj.reshape(tb, s, h) + hb[:, None, :])      # (TB,S,H)

    # Attention scores: reduce v * energy over the small (H=32) feature dim.
    scores = jnp.sum(energy * v[None, :, :], axis=2)                 # (TB, S)

    # Softmax over the (untiled) sequence dim -> exact single-pass softmax.
    m = jnp.max(scores, axis=1, keepdims=True)
    e = jnp.exp(scores - m)
    denom = jnp.sum(e, axis=1, keepdims=True)
    out_ref[...] = (e * pl.reciprocal(denom, approx=True)).astype(out_ref.dtype)


def _vmem_plan():
    """Generation-aware (vmem_limit_bytes, per-tile working-set budget)."""
    try:
        cap = int(pltpu.get_tpu_info().vmem_capacity_bytes)
    except Exception:
        cap = 64 * 1024 * 1024   # conservative fallback == v7x per-TC VMEM
    # 3/4 of capacity as the scoped limit, 3/8 as the tile working-set target:
    #   v7x  (64 MiB):  48 MiB limit, 24 MiB tile budget
    #   v5e/v6e (128 MiB): 96 MiB limit, 48 MiB tile budget
    return (cap * 3) // 4, (cap * 3) // 8


def _num_tensorcores():
    try:
        return max(1, int(getattr(jax.devices()[0], "num_cores", 1)))
    except Exception:
        return 1


def _pick_batch_tile(B, S, H, in_itemsize, budget, min_steps=1):
    """Largest batch tile that (a) is B itself or a multiple of 8 dividing B
    (Mosaic (8,128) rule on tiled second-to-last dims) and (b) keeps the
    double-buffered working set under `budget`.  On multi-TC parts prefer a
    tile whose grid length is a (nonzero) multiple of the TC count."""

    def tile_bytes(tb):
        enc = 2 * tb * S * 2 * H * in_itemsize          # double-buffered enc tile
        hid = 2 * tb * H * in_itemsize
        out = 2 * tb * S * 4
        inter = 2 * tb * S * H * 4 + 6 * tb * S * 4 + tb * H * 4
        weights = 2 * (3 * H * H + 2 * H) * 4
        return enc + hid + out + inter + weights

    cands = sorted({B} | {tb for tb in range(8, B, 8) if B % tb == 0},
                   reverse=True)
    fitting = [tb for tb in cands if tile_bytes(tb) <= budget]
    if min_steps > 1:
        even = [tb for tb in fitting
                if (B // tb) >= min_steps and (B // tb) % min_steps == 0]
        if even:
            return even[0]
    if fitting:
        return fitting[0]
    # S is untiled by design (exact softmax), so the smallest legal tile is the
    # floor; the compiler may still spill if even this exceeds VMEM.
    return cands[-1]


def attention_forward(hidden, encoder_outputs, w, b, v, *, batch_tile=None,
                      operand_dtype=jnp.bfloat16):
    """hidden: (B,H), encoder_outputs: (B,S,2H), w: (H,3H) [PyTorch layout],
    b: (H,), v: (H,).  Returns softmax attention weights (B,S) in f32.

    `operand_dtype` is the MXU/stream dtype for enc / hidden / W (bf16 by
    default; accumulation and all post-matmul math stay f32)."""
    B, H = hidden.shape
    _, S, H2 = encoder_outputs.shape
    assert H2 == 2 * H

    # PyTorch Linear computes x @ W.T; transpose once and split by input block
    # (hidden part vs encoder part of the concat) -- algebraically identical
    # to the concat+matmul in the reference module.
    wt = jnp.transpose(w)                                  # (3H, H)
    wh = wt[:H, :].astype(operand_dtype)                   # applied to hidden
    we = wt[H:, :].astype(operand_dtype)                   # applied to enc
    b2 = b.reshape(1, H).astype(jnp.float32)
    v2 = v.reshape(1, H).astype(jnp.float32)

    hidden_c = hidden.astype(operand_dtype)
    # Free metadata reshape in HBM (row-major contiguous) so the kernel gets a
    # 2D enc tile and the big matmul needs no in-kernel reshape/copy.
    # (Ideally the caller already provides bf16 encoder outputs.)
    enc2d = encoder_outputs.astype(operand_dtype).reshape(B * S, 2 * H)

    in_itemsize = jnp.dtype(operand_dtype).itemsize
    vmem_limit, tile_budget = _vmem_plan()
    if batch_tile is None:
        batch_tile = _pick_batch_tile(B, S, H, in_itemsize, tile_budget,
                                      min_steps=_num_tensorcores())
    TB = batch_tile
    assert B % TB == 0 and (TB == B or TB % 8 == 0), "invalid batch tile"
    grid = (B // TB,)

    flops = (2 * B * S * 2 * H * H       # encoder projection matmul
             + 2 * B * H * H             # hidden projection matmul
             + 6 * B * S * H             # bias add, mul-by-v, reduce
             + 5 * B * S)                # softmax
    transcendentals = B * S * H + B * S  # tanh + exp
    bytes_accessed = (B * S * 2 * H * in_itemsize
                      + B * H * in_itemsize
                      + 3 * H * H * in_itemsize + 2 * H * 4
                      + B * S * 4)

    return pl.pallas_call(
        attention_kernel,
        out_shape=jax.ShapeDtypeStruct((B, S), jnp.float32),
        grid=grid,
        in_specs=[
            pl.BlockSpec((TB, H), lambda i: (i, 0)),            # hidden (streamed)
            pl.BlockSpec((TB * S, 2 * H), lambda i: (i, 0)),    # enc 2D (streamed)
            pl.BlockSpec((H, H), lambda i: (0, 0)),             # W_h (resident)
            pl.BlockSpec((2 * H, H), lambda i: (0, 0)),         # W_e (resident)
            pl.BlockSpec((1, H), lambda i: (0, 0)),             # bias (resident)
            pl.BlockSpec((1, H), lambda i: (0, 0)),             # v    (resident)
        ],
        out_specs=pl.BlockSpec((TB, S), lambda i: (i, 0)),
        compiler_params=pltpu.CompilerParams(
            dimension_semantics=("parallel",),
            vmem_limit_bytes=vmem_limit,
        ),
        cost_estimate=pl.CostEstimate(
            flops=flops,
            transcendentals=transcendentals,
            bytes_accessed=bytes_accessed,
        ),
    )(hidden_c, enc2d, wh, we, b2, v2)


def reference_forward(hidden, encoder_outputs, w, b, v):
    """Plain-JAX replica of the PyTorch module for verification (f32)."""
    B, H = hidden.shape
    S = encoder_outputs.shape[1]
    hid_rep = jnp.broadcast_to(hidden[:, None, :], (B, S, H))
    cat = jnp.concatenate([hid_rep, encoder_outputs], axis=2)      # (B,S,3H)
    energy = jnp.tanh(jnp.einsum("bsk,hk->bsh", cat, w) + b)       # (B,S,H)
    attention = jnp.sum(v * energy, axis=2)                        # (B,S)
    return jax.nn.softmax(attention, axis=1)


def _make_inputs(key, B, S, H):
    k_hid, k_enc, k_w, k_b, k_v = jax.random.split(key, 5)
    hidden = jax.random.normal(k_hid, (B, H), dtype=jnp.float32)
    enc = jax.random.normal(k_enc, (B, S, 2 * H), dtype=jnp.float32)
    bound = 1.0 / jnp.sqrt(3.0 * H)
    w = jax.random.uniform(k_w, (H, 3 * H), minval=-bound, maxval=bound,
                           dtype=jnp.float32)
    b = jax.random.uniform(k_b, (H,), minval=-bound, maxval=bound,
                           dtype=jnp.float32)
    v = jax.random.uniform(k_v, (H,), minval=0.0, maxval=1.0, dtype=jnp.float32)
    return hidden, enc, w, b, v


if __name__ == "__main__":
    # Small shape matching the module (batch=2, seq=8, hidden=32).
    # f32 operands here -> only the approx-reciprocal differs from the reference.
    B, S, H = 2, 8, 32
    hidden, enc, w, b, v = _make_inputs(jax.random.PRNGKey(0), B, S, H)
    out = jax.block_until_ready(
        attention_forward(hidden, enc, w, b, v, operand_dtype=jnp.float32))
    ref = reference_forward(hidden, enc, w, b, v)
    assert out.shape == (B, S)
    assert jnp.allclose(out, ref, atol=5e-3, rtol=5e-3), "mismatch vs reference"
    assert jnp.allclose(jnp.sum(out, axis=1), 1.0, atol=5e-3), "rows must sum to 1"

    # Larger shape exercising the batch grid (2 tiles of 8), a lane-dense S=128
    # output store, and the default bf16 operand path.
    B2, S2, H2 = 16, 128, 32
    hidden2, enc2, w2, b2, v2 = _make_inputs(jax.random.PRNGKey(1), B2, S2, H2)
    out2 = jax.block_until_ready(
        attention_forward(hidden2, enc2, w2, b2, v2, batch_tile=8))
    ref2 = reference_forward(hidden2, enc2, w2, b2, v2)
    assert out2.shape == (B2, S2)
    assert jnp.allclose(out2, ref2, atol=2.5e-2, rtol=2e-2), \
        "mismatch vs reference (gridded, bf16 operands)"
    assert jnp.allclose(jnp.sum(out2, axis=1), 1.0, atol=5e-3), "rows must sum to 1"

    print("KERNEL_OK")
</pallas_src>

<mosaic_0001>
module attributes {stable_mosaic.version = 11 : i64} {
  func.func @attention_kernel(%arg0: i32, %arg1: memref<2x32xf32, #tpu.memory_space<vmem>>, %arg2: memref<16x64xf32, #tpu.memory_space<vmem>>, %arg3: memref<32x32xf32, #tpu.memory_space<vmem>>, %arg4: memref<64x32xf32, #tpu.memory_space<vmem>>, %arg5: memref<1x32xf32, #tpu.memory_space<vmem>>, %arg6: memref<1x32xf32, #tpu.memory_space<vmem>>, %arg7: memref<2x8xf32, #tpu.memory_space<vmem>>) attributes {dimension_semantics = [#tpu.dimension_semantics<parallel>], iteration_bounds = array<i64: 1>, scalar_prefetch = 0 : i64, scratch_operands = 0 : i64, tpu.core_type = #tpu.core_type<tc>, window_params = [{transform_indices = @transform_0, window_bounds = array<i64: 2, 32>}, {transform_indices = @transform_1, window_bounds = array<i64: 16, 64>}, {pipeline_mode = #tpu.pipeline_mode<synchronous>, transform_indices = @transform_2, window_bounds = array<i64: 32, 32>}, {pipeline_mode = #tpu.pipeline_mode<synchronous>, transform_indices = @transform_3, window_bounds = array<i64: 64, 32>}, {pipeline_mode = #tpu.pipeline_mode<synchronous>, transform_indices = @transform_4, window_bounds = array<i64: 1, 32>}, {pipeline_mode = #tpu.pipeline_mode<synchronous>, transform_indices = @transform_5, window_bounds = array<i64: 1, 32>}, {transform_indices = @transform_6, window_bounds = array<i64: 2, 8>}]} {
    %c0 = arith.constant 0 : index
    %c0_0 = arith.constant 0 : index
    %0 = vector.load %arg2[%c0, %c0_0] : memref<16x64xf32, #tpu.memory_space<vmem>>, vector<16x64xf32>
    %c0_1 = arith.constant 0 : index
    %c0_2 = arith.constant 0 : index
    %1 = vector.load %arg4[%c0_1, %c0_2] : memref<64x32xf32, #tpu.memory_space<vmem>>, vector<64x32xf32>
    %cst = arith.constant dense<0.000000e+00> : vector<16x32xf32>
    %2 = tpu.matmul %0, %1, %cst {dimension_numbers = #tpu.dot_dimension_numbers<[1], [0], [0], [1], [0, 0, 1, 1], [], []>} : vector<16x64xf32>, vector<64x32xf32>, vector<16x32xf32> -> vector<16x32xf32>
    %c0_3 = arith.constant 0 : index
    %c0_4 = arith.constant 0 : index
    %3 = vector.load %arg1[%c0_3, %c0_4] : memref<2x32xf32, #tpu.memory_space<vmem>>, vector<2x32xf32>
    %c0_5 = arith.constant 0 : index
    %c0_6 = arith.constant 0 : index
    %4 = vector.load %arg3[%c0_5, %c0_6] : memref<32x32xf32, #tpu.memory_space<vmem>>, vector<32x32xf32>
    %cst_7 = arith.constant dense<0.000000e+00> : vector<2x32xf32>
    %5 = tpu.matmul %3, %4, %cst_7 {dimension_numbers = #tpu.dot_dimension_numbers<[1], [0], [0], [1], [0, 0, 1, 1], [], []>} : vector<2x32xf32>, vector<32x32xf32>, vector<2x32xf32> -> vector<2x32xf32>
    %c0_8 = arith.constant 0 : index
    %c0_9 = arith.constant 0 : index
    %6 = vector.load %arg5[%c0_8, %c0_9] : memref<1x32xf32, #tpu.memory_space<vmem>>, vector<1x32xf32>
    %7 = vector.broadcast %6 : vector<1x32xf32> to vector<2x32xf32>
    %8 = arith.addf %5, %7 : vector<2x32xf32>
    %c0_10 = arith.constant 0 : index
    %c0_11 = arith.constant 0 : index
    %9 = vector.load %arg6[%c0_10, %c0_11] : memref<1x32xf32, #tpu.memory_space<vmem>>, vector<1x32xf32>
    %10 = vector.shape_cast %2 : vector<16x32xf32> to vector<2x8x32xf32>
    %11 = vector.shape_cast %8 : vector<2x32xf32> to vector<2x1x32xf32>
    %12 = vector.broadcast %11 : vector<2x1x32xf32> to vector<2x8x32xf32>
    %13 = arith.addf %10, %12 : vector<2x8x32xf32>
    %14 = math.tanh %13 : vector<2x8x32xf32>
    %15 = vector.shape_cast %9 : vector<1x32xf32> to vector<1x1x32xf32>
    %16 = vector.broadcast %15 : vector<1x1x32xf32> to vector<2x8x32xf32>
    %17 = arith.mulf %14, %16 : vector<2x8x32xf32>
    %cst_12 = arith.constant dense<0.000000e+00> : vector<2x8xf32>
    %18 = vector.multi_reduction <add>, %17, %cst_12 [2] : vector<2x8x32xf32> to vector<2x8xf32>
    %cst_13 = arith.constant dense<0xFF800000> : vector<2xf32>
    %19 = vector.multi_reduction <maximumf>, %18, %cst_13 [1] : vector<2x8xf32> to vector<2xf32>
    %20 = vector.shape_cast %19 : vector<2xf32> to vector<2x1xf32>
    %21 = vector.broadcast %20 : vector<2x1xf32> to vector<2x8xf32>
    %22 = arith.subf %18, %21 : vector<2x8xf32>
    %23 = math.exp %22 : vector<2x8xf32>
    %cst_14 = arith.constant dense<0.000000e+00> : vector<2xf32>
    %24 = vector.multi_reduction <add>, %23, %cst_14 [1] : vector<2x8xf32> to vector<2xf32>
    %25 = vector.shape_cast %24 : vector<2xf32> to vector<2x1xf32>
    %26 = tpu.reciprocal %25 {approx = true} : vector<2x1xf32> -> vector<2x1xf32>
    %27 = vector.broadcast %26 : vector<2x1xf32> to vector<2x8xf32>
    %28 = arith.mulf %23, %27 : vector<2x8xf32>
    %c0_15 = arith.constant 0 : index
    %c0_16 = arith.constant 0 : index
    %29 = vector.load %arg7[%c0_15, %c0_16] : memref<2x8xf32, #tpu.memory_space<vmem>>, vector<2x8xf32>
    tpu.vector_store %arg7[%c0_15, %c0_16], %28 {strides = array<i32>} : memref<2x8xf32, #tpu.memory_space<vmem>>, vector<2x8xf32>,
    return
  }
  func.func @transform_0(%arg0: i32) -> (i32, i32) {
    %c0_i32 = arith.constant 0 : i32
    %c0_i32_0 = arith.constant 0 : i32
    return %arg0, %c0_i32 : i32, i32
  }
  func.func @transform_1(%arg0: i32) -> (i32, i32) {
    %c0_i32 = arith.constant 0 : i32
    %c0_i32_0 = arith.constant 0 : i32
    return %arg0, %c0_i32 : i32, i32
  }
  func.func @transform_2(%arg0: i32) -> (i32, i32) {
    %c0_i32 = arith.constant 0 : i32
    %c0_i32_0 = arith.constant 0 : i32
    %c0_i32_1 = arith.constant 0 : i32
    return %c0_i32, %c0_i32_0 : i32, i32
  }
  func.func @transform_3(%arg0: i32) -> (i32, i32) {
    %c0_i32 = arith.constant 0 : i32
    %c0_i32_0 = arith.constant 0 : i32
    %c0_i32_1 = arith.constant 0 : i32
    return %c0_i32, %c0_i32_0 : i32, i32
  }
  func.func @transform_4(%arg0: i32) -> (i32, i32) {
    %c0_i32 = arith.constant 0 : i32
    %c0_i32_0 = arith.constant 0 : i32
    %c0_i32_1 = arith.constant 0 : i32
    return %c0_i32, %c0_i32_0 : i32, i32
  }
  func.func @transform_5(%arg0: i32) -> (i32, i32) {
    %c0_i32 = arith.constant 0 : i32
    %c0_i32_0 = arith.constant 0 : i32
    %c0_i32_1 = arith.constant 0 : i32
    return %c0_i32, %c0_i32_0 : i32, i32
  }
  func.func @transform_6(%arg0: i32) -> (i32, i32) {
    %c0_i32 = arith.constant 0 : i32
    %c0_i32_0 = arith.constant 0 : i32
    return %arg0, %c0_i32 : i32, i32
  }
}

</mosaic_0001>

<bundles_post_ra>
// kernel: tpu_custom_call.1
= control target key start
LH: loop header
LB: loop body
LE: loop exit
PB: predicated region body
PF: predicated region fallthrough
CT: control target
= control target key end

     0   :  { %v472_v3 = vmov 0.0|0.0   ;;  %vm473_vm0 = vmmov 0   ;;  %v474_v8 = vmov 0.0   ;;  %vm34_vm1 = vcmask 523264   ;;  %s593_s0 = inlined_call_operand.vmem [shape: f32[2,32], index: 0, kind: input, shape index: {}]   ;;  %s594_s1 = inlined_call_operand.vmem [shape: f32[16,64], index: 1, kind: input, shape index: {}]   ;;  %s595_s2 = inlined_call_operand.vmem [shape: f32[32,32], index: 2, kind: input, shape index: {}]   ;;  %s596_s3 = inlined_call_operand.vmem [shape: f32[64,32], index: 3, kind: input, shape index: {}]   ;;  %s597_s4 = inlined_call_operand.vmem [shape: f32[1,32], index: 4, kind: input, shape index: {}]   ;;  %s598_s5 = inlined_call_operand.vmem [shape: f32[1,32], index: 5, kind: input, shape index: {}]   ;;  %s599_s6 = inlined_call_operand.hbm [shape: f32[2,8], index: 6, kind: output, shape index: {}]  }
   0x1   :  { %v26_v0 = vld [vmem:[%s596_s3] sm:$0xff]  ;;  %v27_v1 = vld [vmem:[%s596_s3 + $0x8] sm:$0xff]  ;;  %424 = vmatprep.subr.bf16.mxu1 %v472_v3  ;;  %v28_v6 = vld [vmem:[%s596_s3 + $0x10] sm:$0xff]  ;;  %405 = vmatprep.mubr.msk.f32.mxu1 %vm473_vm0, %v474_v8 }
   0x2   :  { %v117_v2 = vld [vmem:[%s595_s2] sm:$0xff]  ;;  %v408_v4 = vpack.c.bf16 %v27_v1, %v26_v0  ;;  %v118_v5 = vld [vmem:[%s595_s2 + $0x8] sm:$0xff]  ;;  %v29_v7 = vld [vmem:[%s596_s3 + $0x18] sm:$0xff] }
   0x3   :  { %v425_v9 = vpack.c.bf16 %v118_v5, %v117_v2  ;;  %v412_v10 = vpack.c.bf16 %v29_v7, %v28_v6  ;;  %v119_v11 = vld [vmem:[%s595_s2 + $0x10] sm:$0xff]  ;;  %v120_v12 = vld [vmem:[%s595_s2 + $0x18] sm:$0xff]  ;;  %v30_v13 = vld [vmem:[%s596_s3 + $0x20] sm:$0xff] }
   0x4   :  { %409 = vmatprep.subr.bf16.mxu0 %v408_v4  ;;  %v31_v14 = vld [vmem:[%s596_s3 + $0x28] sm:$0xff]  ;;  %v428_v15 = vpack.c.bf16 %v120_v12, %v119_v11  ;;  %v24_v16 = vld [vmem:[%s594_s1] sm:$0xff] }
   0x5   :  { %426 = vmatpush3.bf16.msra.mxu1 %v425_v9  ;;  %411 = vmatpush3.bf16.msra.mxu0 %v408_v4  ;;  %v416_v17 = vpack.c.bf16 %v31_v14, %v30_v13 }
   0x6   :  { %427 = vmatprep.subr.bf16.mxu1 %v472_v3  ;;  %413 = vmatprep.subr.bf16.mxu0 %v412_v10 }
   0x7   :  { %11 = vsyncpa [#allocation3], 0  ;;  %v32_v18 = vld [vmem:[%s596_s3 + $0x30] sm:$0xff]  ;;  %v33_v19 = vld [vmem:[%s596_s3 + $0x38] sm:$0xff]  ;;  %394 = vmatprep.mubr.msk.f32.mxu0 %vm34_vm1, %v24_v16  ;;  %vm128_vm2 = vcmask 261120   ;;  %v207_v25 = vlaneseq  ;;  %vm266_vm3 = vcmask 1041409  }
   0x8   :  { %v116_v20 = vld [vmem:[%s593_s0] sm:$0x3]  ;;  %v420_v21 = vpack.c.bf16 %v33_v19, %v32_v18  ;;  %v25_v22 = vld [vmem:[%s594_s1 + $0x8] sm:$0xff]  ;;  %v475_v23 = vmov 1966171168   ;;  %vm269_vm4 = vcmask 58368  }
   0x9   :  { %429 = vmatpush3.bf16.msra.mxu1 %v428_v15  ;;  %415 = vmatpush3.bf16.msra.mxu0 %v412_v10  ;;  %v205_v24 = vunpack.c.l.s4 %v475_v23  ;;  %v561_v27 = vshrl.u32 %v207_v25, 7  ;;  %v360_v28 = vld [vmem:[%s597_s4] ss:$0 sm:$0xff]  ;;  %v257_v51 = vand.u32 127, %v207_v25  ;;  %v476_v59 = vmov 0  }
   0xa   :  { %417 = vmatprep.subr.bf16.mxu0 %v416_v17  ;;  %v362_v44 = vld [vmem:[%s598_s5] ss:$0 sm:$0xff]  ;;  %437 = vset.pattern.permute.xlu0 %v476_v59  ;;  %s477_s5 = smov [#allocation2]  }
   0xb   :  { %v206_v26 = vunpack.c.0.s8 %v205_v24  ;;  %v228_v34 = vsub.s32 0, %v561_v27  ;;  %v260_v53 = vsub.s32 %v257_v51, %v561_v27  ;;  %436 = vset.pattern.permute.xlu1 %v476_v59  ;;  %v280_v60 = vsub.s32 1, %v561_v27  ;;  %s350_s26 = sshll.u32 %s477_s5, 4  ;;  %s351_s26 = int_to_ptr.vmem [resolvable:$true] %s350_s26 }
   0xc   :  { %406 = vmatmul.mubr.msk.f32.vlgmr.msra.gmra.mrb[0].mxu1 %vm128_vm2, %v116_v20  ;;  %s448_s27 = scalar_lea.vmem %s351_s26, 32  ;;  %p453_p1 = scmp.lt.s32.totalorder %s351_s26, %s351_s26 }
   0xd   :  { %419 = vmatpush3.bf16.msra.mxu0 %v416_v17  ;;  %v209_v29 = vsub.s32 %v206_v26, %v561_v27  ;;  %p449_p0 = scmp.ne.s32.totalorder %s351_s26, %s448_s27  ;;  %p454_p2 = scmp.lt.s32.totalorder %s448_s27, %s448_s27 }
   0xe   :  { %421 = vmatprep.subr.bf16.mxu0 %v420_v21 }
   0xf   :  { %p455_p3 = por %p454_p2, %p453_p1 }
  0x11   :  { %423 = vmatpush3.bf16.msra.mxu0 %v420_v21  ;;  %p456_p4 = pnand %p455_p3, %p449_p0 }
  0x14   :  { %395 = vmatmul.mubr.msk.f32.vlgmr.msra.gmra.mrb[0].mxu0 %vm34_vm1, %v25_v22 }
  0xdf   :  { %v198_v30 = vpop.f32.mrb[0].mxu1 }
  0xe0   :  { %v199_v31 = vadd.f32 %v360_v28, %v198_v30  ;;  %v407_v32 = vpop.f32.mrb[1].mxu1 }
  0xe2   :  { %v210_v33 = vrot.slane %v199_v31, %v209_v29 }
  0xe4   :  { %v211_v35 = vcombine.high %v210_v33, %v210_v33  ;;  %v218_v36 = vrot.slane %v210_v33, %v209_v29 }
  0xe6   :  { %v225_v37 = vrot.slane %v211_v35, %v209_v29  ;;  %v229_v38 = vrot.slane %v218_v36, %v228_v34 }
  0xe7   :  { %v396_v39 = vpop.f32.mrb[0].mxu0 }
  0xe8   :  { %v233_v40 = vrot.slane %v225_v37, %v228_v34  ;;  %v107_v41 = vpop.f32.mrb[1].mxu0 }
  0xe9   :  { %v236_v42 = vadd.f32 %v229_v38, %v107_v41 }
  0xea   :  { %v237_v43 = vadd.f32 %v396_v39, %v233_v40 }
  0xeb   :  { %438 = vtanh.f32 %v236_v42 }
  0xec   :  { %440 = vtanh.f32 %v237_v43 }
  0xf5   :  { %v439_v45 = vpop.eup %438 }
  0xf6   :  { %v441_v46 = vpop.eup %440  ;;  %v246_v47 = vmul.f32 %v439_v45, %v362_v44 }
  0xf7   :  { %v247_v49 = vmul.f32 %v441_v46, %v362_v44 }
  0xf8   :  { %v248_v48 = vsel %vm128_vm2, %v246_v47, 0.0 }
  0xf9   :  { %249 = vadd.xlane.f32.xlu0 %v248_v48  ;;  %v251_v50 = vsel %vm128_vm2, %v247_v49, 0.0 }
  0xfd   :  { %252 = vadd.xlane.f32.xlu0 %v251_v50 }
 0x186   :  { %v250_v52 = vpop.xlane.xlu0 %249 }
 0x187   :  { %v261_v55 = vrot.slane %v250_v52, %v260_v53 }
 0x18a   :  { %v253_v54 = vpop.xlane.xlu0 %252 }
 0x18b   :  { %v265_v56 = vrot.slane %v253_v54, %v260_v53 }
 0x18d   :  { %v267_v57 = vsel %vm266_vm3, %v265_v56, %v261_v55 }
 0x18e   :  { %v270_v58 = vsel %vm269_vm4, %v267_v57, -inf }
 0x18f   :  { %271 = vmax.xlane.f32.xlu1 %v270_v58 }
 0x21c   :  { %v272_v61 = vpop.xlane.xlu1 %271 }
 0x21d   :  { %v277_v62 = vrot.slane %v272_v61, %v228_v34  ;;  %v281_v63 = vrot.slane %v272_v61, %v280_v60 }
 0x21f   :  { %v284_v0 = vsub.f32 %v250_v52, %v277_v62  ;;  %v285_v1 = vsub.f32 %v253_v54, %v281_v63 }
 0x221   :  { %v286_v2 = vmul.f32 1.442695, %v284_v0  ;;  %v288_v3 = vmul.f32 1.442695, %v285_v1 }
 0x223   :  { %442 = vpow2.f32 %v286_v2 }
 0x224   :  { %444 = vpow2.f32 %v288_v3 }
 0x22d   :  { %v443_v4 = vpop.eup %442 }
 0x22e   :  { %v445_v5 = vpop.eup %444  ;;  %293 = vperm.xlu1 %436, %v443_v4  }
 0x22f   :  { %296 = vperm.xlu0 %437, %v445_v5  }
 0x2ad   :  { %v294_v6 = vpop.permute.xlu1 %293 }
 0x2ae   :  { %v297_v7 = vpop.permute.xlu0 %296  ;;  %v301_v8 = vrot.slane %v294_v6, %v260_v53 }
 0x2af   :  { %v305_v9 = vrot.slane %v297_v7, %v260_v53 }
 0x2b1   :  { %v306_v10 = vsel %vm266_vm3, %v305_v9, %v301_v8 }
 0x2b2   :  { %v308_v11 = vsel %vm269_vm4, %v306_v10, 0.0 }
 0x2b3   :  { %309 = vadd.xlane.f32.xlu1 %v308_v11 }
 0x340   :  { %v310_v12 = vpop.xlane.xlu1 %309 }
 0x341   :  { %446 = vrcp.f32 %v310_v12 }
 0x34b   :  { %v447_v13 = vpop.eup %446 }
 0x34c   :  { %v316_v14 = vrot.slane %v447_v13, %v228_v34  ;;  %v320_v16 = vrot.slane %v447_v13, %v280_v60 }
 0x34e   :  { %v323_v15 = vmul.f32 %v443_v4, %v316_v14  ;;  %v324_v17 = vmul.f32 %v445_v5, %v320_v16 }
 0x350   :  { %328 = vperm.xlu0 %437, %v323_v15  }
 0x354   :  { %331 = vperm.xlu0 %437, %v324_v17  }
 0x3cf   :  { %v329_v18 = vpop.permute.xlu0 %328 }
 0x3d0   :  { %v336_v20 = vrot.slane %v329_v18, %v260_v53 }
 0x3d3   :  { %v332_v19 = vpop.permute.xlu0 %331 }
 0x3d4   :  { %v340_v21 = vrot.slane %v332_v19, %v260_v53 }
 0x3d6   :  { %v341_v22 = vsel %vm266_vm3, %v340_v21, %v336_v20 }
 0x3d7   :  { %343 = vst.msk [vmem:[#allocation2] sm:$0x3] %vm269_vm4, %v341_v22 }
 0x3d8   :  { %459 = shalt.err (!%p456_p4)
}
 0x3d9   :  { %s460_s30 = scalar_lea.hbm %s599_s6, 32 }
 0x3da   :  { %p461_p5 = scmp.ne.s32.totalorder %s599_s6, %s460_s30  ;;  %p464_p6 = scmp.lt.u32.totalorder %s460_s30, %s599_s6 }
 0x3dc   :  { %p466_p7 = pnand %p464_p6, %p461_p5 }
 0x3de   :  { %469 = shalt.err (!%p466_p7)
}
 0x3df   :  { %353 = dma.vmem_to_hbm [thread:$0]  %s351_s26, 32, %s599_s6, [#allocation3]  }
 0x3e0   :  { %470 = dma.done.wait [#allocation3], 32  }
 0x3e1   :  { %471 = vsyncadd [#allocation3], 4294967264 }
 0x3e2   :  { %357 = vsyncpa [#allocation3], 1 }

</bundles_post_ra>
